<compile_context>
chip_gen: v7x
topology: tpu7x:2x2x1
jax: 0.10.0
libtpu: 0.0.40
codegen_flags: <defaults>
</compile_context>

<pallas_src>
import functools

import jax
import jax.numpy as jnp
import numpy as np
from jax.experimental import pallas as pl
from jax.experimental.pallas import tpu as pltpu


def _round_up(x, m):
    return ((x + m - 1) // m) * m


def _gru_gauss_kernel(x_ref, w_i_ref, b_x_ref, w_h_ref, b_hn_ref,
                      w_head_ref, b_head_ref,
                      o_ref,
                      gx_scr, hh_scr, h_scr):
    """One time-chunk of the GRU recurrence + fused mu/logvar heads.

    Shapes (per chunk, all padded):
      x_ref      : (T_CHUNK*B, in_dim)   bf16/f32
      w_i_ref    : (in_dim, 3H)          bf16/f32
      b_x_ref    : (1, 3H)               f32   (b_ir+b_hr | b_iz+b_hz | b_in)
      w_h_ref    : (H, 3H)               bf16/f32
      b_hn_ref   : (1, H)                f32
      w_head_ref : (H, HEAD)             bf16/f32  (W_mu | W_lv, lane-padded)
      b_head_ref : (1, HEAD)             f32
      o_ref      : (T_CHUNK*B, HEAD)     f32
      gx_scr     : (T_CHUNK*B, 3H)       f32 scratch (precomputed input gates)
      hh_scr     : (T_CHUNK*B, H)        f32 scratch (h history of the chunk)
      h_scr      : (B, H)                f32 scratch (carry across chunks)
    """
    B = h_scr.shape[0]
    H = h_scr.shape[1]
    t_chunk = hh_scr.shape[0] // B

    # h_0 = 0 (PyTorch default) — only at the first chunk; otherwise the
    # hidden state carried in h_scr persists across grid iterations.
    @pl.when(pl.program_id(0) == 0)
    def _():
        h_scr[...] = jnp.zeros_like(h_scr)

    # ---- Phase 1: chunk-batched input projection (off the serial path). ----
    # (T_CHUNK*B, in_dim) @ (in_dim, 3H) + pre-summed biases, f32 accumulation.
    gx_scr[...] = (
        jnp.dot(x_ref[...], w_i_ref[...], preferred_element_type=jnp.float32)
        + b_x_ref[...]
    )

    # Hoist loop-invariant loads / broadcasts out of the recurrence.
    w_h = w_h_ref[...]                                    # (H, 3H)
    b_hn = jnp.broadcast_to(b_hn_ref[...], (B, H))        # (B, H)

    # ---- Phase 2: serial GRU recurrence (one fused matmul per step). ----
    def step(t, h_prev):
        row = pl.multiple_of(t * B, B)
        gx = gx_scr[pl.ds(row, B), :]                     # (B, 3H) precomputed
        gh = jnp.dot(h_prev.astype(w_h.dtype), w_h,
                     preferred_element_type=jnp.float32)  # (B, 3H) fused gates
        r = jax.nn.sigmoid(gx[:, :H] + gh[:, :H])
        z = jax.nn.sigmoid(gx[:, H:2 * H] + gh[:, H:2 * H])
        n = jnp.tanh(gx[:, 2 * H:] + r * (gh[:, 2 * H:] + b_hn))
        h_new = (1.0 - z) * n + z * h_prev
        hh_scr[pl.ds(row, B), :] = h_new
        return h_new

    h_last = jax.lax.fori_loop(0, t_chunk, step, h_scr[...], unroll=True)
    h_scr[...] = h_last

    # ---- Phase 3: fused mu/logvar heads — one lane-dense matmul + store. ----
    o_ref[...] = (
        jnp.dot(hh_scr[...].astype(w_head_ref.dtype), w_head_ref[...],
                preferred_element_type=jnp.float32)
        + b_head_ref[...]
    ).astype(o_ref.dtype)


def gaussian_recurrent_forward(x, params, *, t_chunk=8,
                               weight_dtype=jnp.bfloat16):
    """x: (B, T, in_dim) float32 (batch_first, as in PyTorch).
    Returns (mu, mu, logvar), each (B, T, out_dim) — eval-mode semantics."""
    B, T, in_dim = x.shape
    H = params["w_hr"].shape[0]
    out_dim = params["w_mu"].shape[1]

    # ---- Padded, TPU-friendly dimensions. ----
    B_pad = _round_up(B, 8)                    # sublane multiple
    H_pad = _round_up(H, 128)                  # lane multiple
    head_pad = _round_up(2 * out_dim, 128)     # lane-dense combined heads
    t_chunk = max(1, min(t_chunk, T))
    T_pad = _round_up(T, t_chunk)
    n_chunks = T_pad // t_chunk
    rows = t_chunk * B_pad

    def pad2(a, r, c):
        return jnp.pad(a, ((0, r - a.shape[0]), (0, c - a.shape[1])))

    # ---- Pack / fuse weights (done once, outside the kernel). ----
    # Fused input weights (in_dim, 3H) and pre-summed biases.
    w_i = jnp.concatenate([pad2(params["w_ir"], in_dim, H_pad),
                           pad2(params["w_iz"], in_dim, H_pad),
                           pad2(params["w_in"], in_dim, H_pad)], axis=1)
    b_x = jnp.concatenate([pad2(params["b_ir"] + params["b_hr"], 1, H_pad),
                           pad2(params["b_iz"] + params["b_hz"], 1, H_pad),
                           pad2(params["b_in"], 1, H_pad)], axis=1)
    # Fused hidden weights (H, 3H); b_hn stays separate (inside r * (.)).
    w_h = jnp.concatenate([pad2(params["w_hr"], H_pad, H_pad),
                           pad2(params["w_hz"], H_pad, H_pad),
                           pad2(params["w_hn"], H_pad, H_pad)], axis=1)
    b_hn = pad2(params["b_hn"], 1, H_pad)
    # Fused mu/logvar heads (H, head_pad).
    w_head = jnp.concatenate([pad2(params["w_mu"], H_pad, out_dim),
                              pad2(params["w_lv"], H_pad, out_dim)], axis=1)
    w_head = jnp.pad(w_head, ((0, 0), (0, head_pad - 2 * out_dim)))
    b_head = jnp.pad(jnp.concatenate([params["b_mu"], params["b_lv"]], axis=1),
                     ((0, 0), (0, head_pad - 2 * out_dim)))

    # bf16 matmul operands (v6e/v7x MXU-native); biases & gate math stay f32.
    w_i = w_i.astype(weight_dtype)
    w_h = w_h.astype(weight_dtype)
    w_head = w_head.astype(weight_dtype)
    b_x = b_x.astype(jnp.float32)
    b_hn = b_hn.astype(jnp.float32)
    b_head = b_head.astype(jnp.float32)

    # ---- x: (B, T, in) -> time-major, padded, flattened (T_pad*B_pad, in). ----
    x_tm = jnp.transpose(x, (1, 0, 2))
    x_tm = jnp.pad(x_tm, ((0, T_pad - T), (0, B_pad - B), (0, 0)))
    x_2d = x_tm.reshape(T_pad * B_pad, in_dim).astype(weight_dtype)

    const = lambda i: (0, 0)  # full-block weights stay resident across chunks

    out = pl.pallas_call(
        _gru_gauss_kernel,
        out_shape=jax.ShapeDtypeStruct((T_pad * B_pad, head_pad), jnp.float32),
        grid_spec=pltpu.PrefetchScalarGridSpec(
            num_scalar_prefetch=0,
            grid=(n_chunks,),
            in_specs=[
                pl.BlockSpec((rows, in_dim), lambda i: (i, 0)),        # x chunk
                pl.BlockSpec((in_dim, 3 * H_pad), const),              # w_i
                pl.BlockSpec((1, 3 * H_pad), const),                   # b_x
                pl.BlockSpec((H_pad, 3 * H_pad), const),               # w_h
                pl.BlockSpec((1, H_pad), const),                       # b_hn
                pl.BlockSpec((H_pad, head_pad), const),                # w_head
                pl.BlockSpec((1, head_pad), const),                    # b_head
            ],
            out_specs=pl.BlockSpec((rows, head_pad), lambda i: (i, 0)),
            scratch_shapes=[
                pltpu.VMEM((rows, 3 * H_pad), jnp.float32),   # gx (input gates)
                pltpu.VMEM((rows, H_pad), jnp.float32),       # h history (chunk)
                pltpu.VMEM((B_pad, H_pad), jnp.float32),      # h carry
            ],
        ),
        compiler_params=pltpu.CompilerParams(
            dimension_semantics=("arbitrary",)),  # serial carry over time chunks
    )(x_2d, w_i, b_x, w_h, b_hn, w_head, b_head)

    out = out.reshape(T_pad, B_pad, head_pad)[:T, :B, :]
    out = jnp.transpose(out, (1, 0, 2))          # back to (B, T, ·)
    mu = out[..., :out_dim]
    logvar = out[..., out_dim:2 * out_dim]
    # Eval mode: z aliases mu (same as the PyTorch module's return).
    return mu, mu, logvar


def _ref_forward(x, p):
    """Pure-JAX reference (lax.scan GRU) for numerical verification."""
    B = x.shape[0]
    H = p["w_hr"].shape[0]

    def cell(h, x_t):
        r = jax.nn.sigmoid(x_t @ p["w_ir"] + p["b_ir"] + h @ p["w_hr"] + p["b_hr"])
        z = jax.nn.sigmoid(x_t @ p["w_iz"] + p["b_iz"] + h @ p["w_hz"] + p["b_hz"])
        n = jnp.tanh(x_t @ p["w_in"] + p["b_in"] + r * (h @ p["w_hn"] + p["b_hn"]))
        h_new = (1.0 - z) * n + z * h
        return h_new, h_new

    h0 = jnp.zeros((B, H), jnp.float32)
    _, hs = jax.lax.scan(cell, h0, jnp.transpose(x, (1, 0, 2)))  # (T, B, H)
    h = jnp.transpose(hs, (1, 0, 2))                              # (B, T, H)
    mu = h @ p["w_mu"] + p["b_mu"]
    lv = h @ p["w_lv"] + p["b_lv"]
    return mu, mu, lv


def _init_params(key, in_dim, hidden_dim, out_dim):
    """Deterministic synthetic init mirroring the PyTorch parameter shapes
    (stored pre-transposed as (fan_in, fan_out) for the kernel)."""
    ks = jax.random.split(key, 16)
    s = 1.0 / np.sqrt(hidden_dim)
    u = lambda k, shape: jax.random.uniform(k, shape, jnp.float32, -s, s)
    return {
        # GRU input weights  (in_dim, H) each — PyTorch weight_ih_l0 is (3H, in_dim)
        "w_ir": u(ks[0], (in_dim, hidden_dim)),
        "w_iz": u(ks[1], (in_dim, hidden_dim)),
        "w_in": u(ks[2], (in_dim, hidden_dim)),
        # GRU hidden weights (H, H) each — PyTorch weight_hh_l0 is (3H, H)
        "w_hr": u(ks[3], (hidden_dim, hidden_dim)),
        "w_hz": u(ks[4], (hidden_dim, hidden_dim)),
        "w_hn": u(ks[5], (hidden_dim, hidden_dim)),
        # GRU biases (kept 2D (1, H) for clean TPU layout / broadcasting)
        "b_ir": u(ks[6], (1, hidden_dim)),
        "b_iz": u(ks[7], (1, hidden_dim)),
        "b_in": u(ks[8], (1, hidden_dim)),
        "b_hr": u(ks[9], (1, hidden_dim)),
        "b_hz": u(ks[10], (1, hidden_dim)),
        "b_hn": u(ks[11], (1, hidden_dim)),
        # Linear heads (H, out_dim) + (1, out_dim)
        "w_mu": u(ks[12], (hidden_dim, out_dim)),
        "b_mu": u(ks[13], (1, out_dim)),
        "w_lv": u(ks[14], (hidden_dim, out_dim)),
        "b_lv": u(ks[15], (1, out_dim)),
    }


if __name__ == "__main__":
    # hidden_dim=128 matches the PyTorch module default.
    B, T, IN_DIM, HIDDEN, OUT_DIM = 2, 8, 4, 128, 4

    key = jax.random.PRNGKey(0)
    k_x, k_p = jax.random.split(key)
    x = jax.random.normal(k_x, (B, T, IN_DIM), jnp.float32)
    params = _init_params(k_p, IN_DIM, HIDDEN, OUT_DIM)

    # t_chunk=4 -> grid of 2 chunks, exercising the cross-chunk hidden carry.
    fwd = jax.jit(functools.partial(gaussian_recurrent_forward, t_chunk=4))
    z, mu, logvar = fwd(x, params)
    jax.block_until_ready((z, mu, logvar))

    z_r, mu_r, lv_r = _ref_forward(x, params)
    np.testing.assert_allclose(np.asarray(mu), np.asarray(mu_r), atol=5e-2, rtol=5e-2)
    np.testing.assert_allclose(np.asarray(logvar), np.asarray(lv_r), atol=5e-2, rtol=5e-2)
    np.testing.assert_allclose(np.asarray(z), np.asarray(mu), atol=0, rtol=0)
    assert mu.shape == (B, T, OUT_DIM) and logvar.shape == (B, T, OUT_DIM)

    print("KERNEL_OK")
</pallas_src>

<mosaic_0001>
module attributes {stable_mosaic.version = 11 : i64} {
  func.func @_gru_gauss_kernel(%arg0: i32, %arg1: memref<32x4xbf16, #tpu.memory_space<vmem>>, %arg2: memref<4x384xbf16, #tpu.memory_space<vmem>>, %arg3: memref<1x384xf32, #tpu.memory_space<vmem>>, %arg4: memref<128x384xbf16, #tpu.memory_space<vmem>>, %arg5: memref<1x128xf32, #tpu.memory_space<vmem>>, %arg6: memref<128x128xbf16, #tpu.memory_space<vmem>>, %arg7: memref<1x128xf32, #tpu.memory_space<vmem>>, %arg8: memref<32x128xf32, #tpu.memory_space<vmem>>, %arg9: memref<32x384xf32, #tpu.memory_space<vmem>>, %arg10: memref<32x128xf32, #tpu.memory_space<vmem>>, %arg11: memref<8x128xf32, #tpu.memory_space<vmem>>) attributes {dimension_semantics = [#tpu.dimension_semantics<arbitrary>], iteration_bounds = array<i64: 2>, scalar_prefetch = 0 : i64, scratch_operands = 3 : i64, tpu.core_type = #tpu.core_type<tc>, window_params = [{transform_indices = @transform_0, window_bounds = array<i64: 32, 4>}, {pipeline_mode = #tpu.pipeline_mode<synchronous>, transform_indices = @transform_1, window_bounds = array<i64: 4, 384>}, {pipeline_mode = #tpu.pipeline_mode<synchronous>, transform_indices = @transform_2, window_bounds = array<i64: 1, 384>}, {pipeline_mode = #tpu.pipeline_mode<synchronous>, transform_indices = @transform_3, window_bounds = array<i64: 128, 384>}, {pipeline_mode = #tpu.pipeline_mode<synchronous>, transform_indices = @transform_4, window_bounds = array<i64: 1, 128>}, {pipeline_mode = #tpu.pipeline_mode<synchronous>, transform_indices = @transform_5, window_bounds = array<i64: 128, 128>}, {pipeline_mode = #tpu.pipeline_mode<synchronous>, transform_indices = @transform_6, window_bounds = array<i64: 1, 128>}, {transform_indices = @transform_7, window_bounds = array<i64: 32, 128>}]} {
    %c0_i32 = arith.constant 0 : i32
    %0 = arith.cmpi eq, %arg0, %c0_i32 : i32
    %1 = arith.extui %0 : i1 to i32
    %c0_i32_0 = arith.constant 0 : i32
    %2 = arith.cmpi ne, %1, %c0_i32_0 : i32
    scf.if %2 {
      %cst_53 = arith.constant 0.000000e+00 : f32
      %164 = vector.broadcast %cst_53 : f32 to vector<8x128xf32>
      %c0_54 = arith.constant 0 : index
      %c0_55 = arith.constant 0 : index
      %165 = vector.load %arg11[%c0_54, %c0_55] : memref<8x128xf32, #tpu.memory_space<vmem>>, vector<8x128xf32>
      tpu.vector_store %arg11[%c0_54, %c0_55], %164 {strides = array<i32>} : memref<8x128xf32, #tpu.memory_space<vmem>>, vector<8x128xf32>,
    } else {
    }
    %c0 = arith.constant 0 : index
    %c0_1 = arith.constant 0 : index
    %3 = vector.load %arg1[%c0, %c0_1] : memref<32x4xbf16, #tpu.memory_space<vmem>>, vector<32x4xbf16>
    %c0_2 = arith.constant 0 : index
    %c0_3 = arith.constant 0 : index
    %4 = vector.load %arg2[%c0_2, %c0_3] : memref<4x384xbf16, #tpu.memory_space<vmem>>, vector<4x384xbf16>
    %cst = arith.constant dense<0.000000e+00> : vector<32x384xf32>
    %5 = tpu.matmul %3, %4, %cst {dimension_numbers = #tpu.dot_dimension_numbers<[1], [0], [0], [1], [0, 0, 1, 1], [], []>} : vector<32x4xbf16>, vector<4x384xbf16>, vector<32x384xf32> -> vector<32x384xf32>
    %c0_4 = arith.constant 0 : index
    %c0_5 = arith.constant 0 : index
    %6 = vector.load %arg3[%c0_4, %c0_5] : memref<1x384xf32, #tpu.memory_space<vmem>>, vector<1x384xf32>
    %7 = vector.broadcast %6 : vector<1x384xf32> to vector<32x384xf32>
    %8 = arith.addf %5, %7 : vector<32x384xf32>
    %c0_6 = arith.constant 0 : index
    %c0_7 = arith.constant 0 : index
    %9 = vector.load %arg9[%c0_6, %c0_7] : memref<32x384xf32, #tpu.memory_space<vmem>>, vector<32x384xf32>
    tpu.vector_store %arg9[%c0_6, %c0_7], %8 {strides = array<i32>} : memref<32x384xf32, #tpu.memory_space<vmem>>, vector<32x384xf32>,
    %c0_8 = arith.constant 0 : index
    %c0_9 = arith.constant 0 : index
    %10 = vector.load %arg4[%c0_8, %c0_9] : memref<128x384xbf16, #tpu.memory_space<vmem>>, vector<128x384xbf16>
    %c0_10 = arith.constant 0 : index
    %c0_11 = arith.constant 0 : index
    %11 = vector.load %arg5[%c0_10, %c0_11] : memref<1x128xf32, #tpu.memory_space<vmem>>, vector<1x128xf32>
    %12 = vector.shape_cast %11 : vector<1x128xf32> to vector<1x128xf32>
    %13 = vector.broadcast %12 : vector<1x128xf32> to vector<8x128xf32>
    %c0_12 = arith.constant 0 : index
    %c0_13 = arith.constant 0 : index
    %14 = vector.load %arg11[%c0_12, %c0_13] : memref<8x128xf32, #tpu.memory_space<vmem>>, vector<8x128xf32>
    %c0_i32_14 = arith.constant 0 : i32
    %c8_i32 = arith.constant 8 : i32
    %15 = arith.muli %c0_i32_14, %c8_i32 : i32
    %16 = tpu.assume_multiple %15, 8 : i32
    %17 = arith.index_cast %16 : i32 to index
    %c0_15 = arith.constant 0 : index
    %18 = vector.load %arg9[%17, %c0_15] : memref<32x384xf32, #tpu.memory_space<vmem>>, vector<8x384xf32>
    %19 = arith.truncf %14 : vector<8x128xf32> to vector<8x128xbf16>
    %cst_16 = arith.constant dense<0.000000e+00> : vector<8x384xf32>
    %20 = tpu.matmul %19, %10, %cst_16 {dimension_numbers = #tpu.dot_dimension_numbers<[1], [0], [0], [1], [0, 0, 1, 1], [], []>} : vector<8x128xbf16>, vector<128x384xbf16>, vector<8x384xf32> -> vector<8x384xf32>
    %21 = vector.extract_strided_slice %18 {offsets = [0, 0], sizes = [8, 128], strides = [1, 1]} : vector<8x384xf32> to vector<8x128xf32>
    %22 = vector.extract_strided_slice %20 {offsets = [0, 0], sizes = [8, 128], strides = [1, 1]} : vector<8x384xf32> to vector<8x128xf32>
    %23 = arith.addf %21, %22 : vector<8x128xf32>
    %24 = arith.negf %23 : vector<8x128xf32>
    %25 = math.exp %24 : vector<8x128xf32>
    %cst_17 = arith.constant 1.000000e+00 : f32
    %26 = vector.broadcast %cst_17 : f32 to vector<8x128xf32>
    %27 = arith.addf %26, %25 : vector<8x128xf32>
    %28 = arith.divf %26, %27 : vector<8x128xf32>
    %29 = vector.extract_strided_slice %18 {offsets = [0, 128], sizes = [8, 128], strides = [1, 1]} : vector<8x384xf32> to vector<8x128xf32>
    %30 = vector.extract_strided_slice %20 {offsets = [0, 128], sizes = [8, 128], strides = [1, 1]} : vector<8x384xf32> to vector<8x128xf32>
    %31 = arith.addf %29, %30 : vector<8x128xf32>
    %32 = arith.negf %31 : vector<8x128xf32>
    %33 = math.exp %32 : vector<8x128xf32>
    %cst_18 = arith.constant 1.000000e+00 : f32
    %34 = vector.broadcast %cst_18 : f32 to vector<8x128xf32>
    %35 = arith.addf %34, %33 : vector<8x128xf32>
    %36 = arith.divf %34, %35 : vector<8x128xf32>
    %37 = vector.extract_strided_slice %18 {offsets = [0, 256], sizes = [8, 128], strides = [1, 1]} : vector<8x384xf32> to vector<8x128xf32>
    %38 = vector.extract_strided_slice %20 {offsets = [0, 256], sizes = [8, 128], strides = [1, 1]} : vector<8x384xf32> to vector<8x128xf32>
    %39 = arith.addf %38, %13 : vector<8x128xf32>
    %40 = arith.mulf %28, %39 : vector<8x128xf32>
    %41 = arith.addf %37, %40 : vector<8x128xf32>
    %42 = math.tanh %41 : vector<8x128xf32>
    %cst_19 = arith.constant 1.000000e+00 : f32
    %43 = vector.broadcast %cst_19 : f32 to vector<8x128xf32>
    %44 = arith.subf %43, %36 : vector<8x128xf32>
    %45 = arith.mulf %44, %42 : vector<8x128xf32>
    %46 = arith.mulf %36, %14 : vector<8x128xf32>
    %47 = arith.addf %45, %46 : vector<8x128xf32>
    %48 = arith.index_cast %16 : i32 to index
    %c0_20 = arith.constant 0 : index
    %49 = vector.load %arg10[%48, %c0_20] : memref<32x128xf32, #tpu.memory_space<vmem>>, vector<8x128xf32>
    tpu.vector_store %arg10[%48, %c0_20], %47 {strides = array<i32>} : memref<32x128xf32, #tpu.memory_space<vmem>>, vector<8x128xf32>,
    %c1_i32 = arith.constant 1 : i32
    %c8_i32_21 = arith.constant 8 : i32
    %50 = arith.muli %c1_i32, %c8_i32_21 : i32
    %51 = tpu.assume_multiple %50, 8 : i32
    %52 = arith.index_cast %51 : i32 to index
    %c0_22 = arith.constant 0 : index
    %53 = vector.load %arg9[%52, %c0_22] : memref<32x384xf32, #tpu.memory_space<vmem>>, vector<8x384xf32>
    %54 = arith.truncf %47 : vector<8x128xf32> to vector<8x128xbf16>
    %cst_23 = arith.constant dense<0.000000e+00> : vector<8x384xf32>
    %55 = tpu.matmul %54, %10, %cst_23 {dimension_numbers = #tpu.dot_dimension_numbers<[1], [0], [0], [1], [0, 0, 1, 1], [], []>} : vector<8x128xbf16>, vector<128x384xbf16>, vector<8x384xf32> -> vector<8x384xf32>
    %56 = vector.extract_strided_slice %53 {offsets = [0, 0], sizes = [8, 128], strides = [1, 1]} : vector<8x384xf32> to vector<8x128xf32>
    %57 = vector.extract_strided_slice %55 {offsets = [0, 0], sizes = [8, 128], strides = [1, 1]} : vector<8x384xf32> to vector<8x128xf32>
    %58 = arith.addf %56, %57 : vector<8x128xf32>
    %59 = arith.negf %58 : vector<8x128xf32>
    %60 = math.exp %59 : vector<8x128xf32>
    %cst_24 = arith.constant 1.000000e+00 : f32
    %61 = vector.broadcast %cst_24 : f32 to vector<8x128xf32>
    %62 = arith.addf %61, %60 : vector<8x128xf32>
    %63 = arith.divf %61, %62 : vector<8x128xf32>
    %64 = vector.extract_strided_slice %53 {offsets = [0, 128], sizes = [8, 128], strides = [1, 1]} : vector<8x384xf32> to vector<8x128xf32>
    %65 = vector.extract_strided_slice %55 {offsets = [0, 128], sizes = [8, 128], strides = [1, 1]} : vector<8x384xf32> to vector<8x128xf32>
    %66 = arith.addf %64, %65 : vector<8x128xf32>
    %67 = arith.negf %66 : vector<8x128xf32>
    %68 = math.exp %67 : vector<8x128xf32>
    %cst_25 = arith.constant 1.000000e+00 : f32
    %69 = vector.broadcast %cst_25 : f32 to vector<8x128xf32>
    %70 = arith.addf %69, %68 : vector<8x128xf32>
    %71 = arith.divf %69, %70 : vector<8x128xf32>
    %72 = vector.extract_strided_slice %53 {offsets = [0, 256], sizes = [8, 128], strides = [1, 1]} : vector<8x384xf32> to vector<8x128xf32>
    %73 = vector.extract_strided_slice %55 {offsets = [0, 256], sizes = [8, 128], strides = [1, 1]} : vector<8x384xf32> to vector<8x128xf32>
    %74 = arith.addf %73, %13 : vector<8x128xf32>
    %75 = arith.mulf %63, %74 : vector<8x128xf32>
    %76 = arith.addf %72, %75 : vector<8x128xf32>
    %77 = math.tanh %76 : vector<8x128xf32>
    %cst_26 = arith.constant 1.000000e+00 : f32
    %78 = vector.broadcast %cst_26 : f32 to vector<8x128xf32>
    %79 = arith.subf %78, %71 : vector<8x128xf32>
    %80 = arith.mulf %79, %77 : vector<8x128xf32>
    %81 = arith.mulf %71, %47 : vector<8x128xf32>
    %82 = arith.addf %80, %81 : vector<8x128xf32>
    %83 = arith.index_cast %51 : i32 to index
    %c0_27 = arith.constant 0 : index
    %84 = vector.load %arg10[%83, %c0_27] : memref<32x128xf32, #tpu.memory_space<vmem>>, vector<8x128xf32>
    tpu.vector_store %arg10[%83, %c0_27], %82 {strides = array<i32>} : memref<32x128xf32, #tpu.memory_space<vmem>>, vector<8x128xf32>,
    %c2_i32 = arith.constant 2 : i32
    %c8_i32_28 = arith.constant 8 : i32
    %85 = arith.muli %c2_i32, %c8_i32_28 : i32
    %86 = tpu.assume_multiple %85, 8 : i32
    %87 = arith.index_cast %86 : i32 to index
    %c0_29 = arith.constant 0 : index
    %88 = vector.load %arg9[%87, %c0_29] : memref<32x384xf32, #tpu.memory_space<vmem>>, vector<8x384xf32>
    %89 = arith.truncf %82 : vector<8x128xf32> to vector<8x128xbf16>
    %cst_30 = arith.constant dense<0.000000e+00> : vector<8x384xf32>
    %90 = tpu.matmul %89, %10, %cst_30 {dimension_numbers = #tpu.dot_dimension_numbers<[1], [0], [0], [1], [0, 0, 1, 1], [], []>} : vector<8x128xbf16>, vector<128x384xbf16>, vector<8x384xf32> -> vector<8x384xf32>
    %91 = vector.extract_strided_slice %88 {offsets = [0, 0], sizes = [8, 128], strides = [1, 1]} : vector<8x384xf32> to vector<8x128xf32>
    %92 = vector.extract_strided_slice %90 {offsets = [0, 0], sizes = [8, 128], strides = [1, 1]} : vector<8x384xf32> to vector<8x128xf32>
    %93 = arith.addf %91, %92 : vector<8x128xf32>
    %94 = arith.negf %93 : vector<8x128xf32>
    %95 = math.exp %94 : vector<8x128xf32>
    %cst_31 = arith.constant 1.000000e+00 : f32
    %96 = vector.broadcast %cst_31 : f32 to vector<8x128xf32>
    %97 = arith.addf %96, %95 : vector<8x128xf32>
    %98 = arith.divf %96, %97 : vector<8x128xf32>
    %99 = vector.extract_strided_slice %88 {offsets = [0, 128], sizes = [8, 128], strides = [1, 1]} : vector<8x384xf32> to vector<8x128xf32>
    %100 = vector.extract_strided_slice %90 {offsets = [0, 128], sizes = [8, 128], strides = [1, 1]} : vector<8x384xf32> to vector<8x128xf32>
    %101 = arith.addf %99, %100 : vector<8x128xf32>
    %102 = arith.negf %101 : vector<8x128xf32>
    %103 = math.exp %102 : vector<8x128xf32>
    %cst_32 = arith.constant 1.000000e+00 : f32
    %104 = vector.broadcast %cst_32 : f32 to vector<8x128xf32>
    %105 = arith.addf %104, %103 : vector<8x128xf32>
    %106 = arith.divf %104, %105 : vector<8x128xf32>
    %107 = vector.extract_strided_slice %88 {offsets = [0, 256], sizes = [8, 128], strides = [1, 1]} : vector<8x384xf32> to vector<8x128xf32>
    %108 = vector.extract_strided_slice %90 {offsets = [0, 256], sizes = [8, 128], strides = [1, 1]} : vector<8x384xf32> to vector<8x128xf32>
    %109 = arith.addf %108, %13 : vector<8x128xf32>
    %110 = arith.mulf %98, %109 : vector<8x128xf32>
    %111 = arith.addf %107, %110 : vector<8x128xf32>
    %112 = math.tanh %111 : vector<8x128xf32>
    %cst_33 = arith.constant 1.000000e+00 : f32
    %113 = vector.broadcast %cst_33 : f32 to vector<8x128xf32>
    %114 = arith.subf %113, %106 : vector<8x128xf32>
    %115 = arith.mulf %114, %112 : vector<8x128xf32>
    %116 = arith.mulf %106, %82 : vector<8x128xf32>
    %117 = arith.addf %115, %116 : vector<8x128xf32>
    %118 = arith.index_cast %86 : i32 to index
    %c0_34 = arith.constant 0 : index
    %119 = vector.load %arg10[%118, %c0_34] : memref<32x128xf32, #tpu.memory_space<vmem>>, vector<8x128xf32>
    tpu.vector_store %arg10[%118, %c0_34], %117 {strides = array<i32>} : memref<32x128xf32, #tpu.memory_space<vmem>>, vector<8x128xf32>,
    %c3_i32 = arith.constant 3 : i32
    %c8_i32_35 = arith.constant 8 : i32
    %120 = arith.muli %c3_i32, %c8_i32_35 : i32
    %121 = tpu.assume_multiple %120, 8 : i32
    %122 = arith.index_cast %121 : i32 to index
    %c0_36 = arith.constant 0 : index
    %123 = vector.load %arg9[%122, %c0_36] : memref<32x384xf32, #tpu.memory_space<vmem>>, vector<8x384xf32>
    %124 = arith.truncf %117 : vector<8x128xf32> to vector<8x128xbf16>
    %cst_37 = arith.constant dense<0.000000e+00> : vector<8x384xf32>
    %125 = tpu.matmul %124, %10, %cst_37 {dimension_numbers = #tpu.dot_dimension_numbers<[1], [0], [0], [1], [0, 0, 1, 1], [], []>} : vector<8x128xbf16>, vector<128x384xbf16>, vector<8x384xf32> -> vector<8x384xf32>
    %126 = vector.extract_strided_slice %123 {offsets = [0, 0], sizes = [8, 128], strides = [1, 1]} : vector<8x384xf32> to vector<8x128xf32>
    %127 = vector.extract_strided_slice %125 {offsets = [0, 0], sizes = [8, 128], strides = [1, 1]} : vector<8x384xf32> to vector<8x128xf32>
    %128 = arith.addf %126, %127 : vector<8x128xf32>
    %129 = arith.negf %128 : vector<8x128xf32>
    %130 = math.exp %129 : vector<8x128xf32>
    %cst_38 = arith.constant 1.000000e+00 : f32
    %131 = vector.broadcast %cst_38 : f32 to vector<8x128xf32>
    %132 = arith.addf %131, %130 : vector<8x128xf32>
    %133 = arith.divf %131, %132 : vector<8x128xf32>
    %134 = vector.extract_strided_slice %123 {offsets = [0, 128], sizes = [8, 128], strides = [1, 1]} : vector<8x384xf32> to vector<8x128xf32>
    %135 = vector.extract_strided_slice %125 {offsets = [0, 128], sizes = [8, 128], strides = [1, 1]} : vector<8x384xf32> to vector<8x128xf32>
    %136 = arith.addf %134, %135 : vector<8x128xf32>
    %137 = arith.negf %136 : vector<8x128xf32>
    %138 = math.exp %137 : vector<8x128xf32>
    %cst_39 = arith.constant 1.000000e+00 : f32
    %139 = vector.broadcast %cst_39 : f32 to vector<8x128xf32>
    %140 = arith.addf %139, %138 : vector<8x128xf32>
    %141 = arith.divf %139, %140 : vector<8x128xf32>
    %142 = vector.extract_strided_slice %123 {offsets = [0, 256], sizes = [8, 128], strides = [1, 1]} : vector<8x384xf32> to vector<8x128xf32>
    %143 = vector.extract_strided_slice %125 {offsets = [0, 256], sizes = [8, 128], strides = [1, 1]} : vector<8x384xf32> to vector<8x128xf32>
    %144 = arith.addf %143, %13 : vector<8x128xf32>
    %145 = arith.mulf %133, %144 : vector<8x128xf32>
    %146 = arith.addf %142, %145 : vector<8x128xf32>
    %147 = math.tanh %146 : vector<8x128xf32>
    %cst_40 = arith.constant 1.000000e+00 : f32
    %148 = vector.broadcast %cst_40 : f32 to vector<8x128xf32>
    %149 = arith.subf %148, %141 : vector<8x128xf32>
    %150 = arith.mulf %149, %147 : vector<8x128xf32>
    %151 = arith.mulf %141, %117 : vector<8x128xf32>
    %152 = arith.addf %150, %151 : vector<8x128xf32>
    %153 = arith.index_cast %121 : i32 to index
    %c0_41 = arith.constant 0 : index
    %154 = vector.load %arg10[%153, %c0_41] : memref<32x128xf32, #tpu.memory_space<vmem>>, vector<8x128xf32>
    tpu.vector_store %arg10[%153, %c0_41], %152 {strides = array<i32>} : memref<32x128xf32, #tpu.memory_space<vmem>>, vector<8x128xf32>,
    %c4_i32 = arith.constant 4 : i32
    %c0_42 = arith.constant 0 : index
    %c0_43 = arith.constant 0 : index
    %155 = vector.load %arg11[%c0_42, %c0_43] : memref<8x128xf32, #tpu.memory_space<vmem>>, vector<8x128xf32>
    tpu.vector_store %arg11[%c0_42, %c0_43], %152 {strides = array<i32>} : memref<8x128xf32, #tpu.memory_space<vmem>>, vector<8x128xf32>,
    %c0_44 = arith.constant 0 : index
    %c0_45 = arith.constant 0 : index
    %156 = vector.load %arg10[%c0_44, %c0_45] : memref<32x128xf32, #tpu.memory_space<vmem>>, vector<32x128xf32>
    %157 = arith.truncf %156 : vector<32x128xf32> to vector<32x128xbf16>
    %c0_46 = arith.constant 0 : index
    %c0_47 = arith.constant 0 : index
    %158 = vector.load %arg6[%c0_46, %c0_47] : memref<128x128xbf16, #tpu.memory_space<vmem>>, vector<128x128xbf16>
    %cst_48 = arith.constant dense<0.000000e+00> : vector<32x128xf32>
    %159 = tpu.matmul %157, %158, %cst_48 {dimension_numbers = #tpu.dot_dimension_numbers<[1], [0], [0], [1], [0, 0, 1, 1], [], []>} : vector<32x128xbf16>, vector<128x128xbf16>, vector<32x128xf32> -> vector<32x128xf32>
    %c0_49 = arith.constant 0 : index
    %c0_50 = arith.constant 0 : index
    %160 = vector.load %arg7[%c0_49, %c0_50] : memref<1x128xf32, #tpu.memory_space<vmem>>, vector<1x128xf32>
    %161 = vector.broadcast %160 : vector<1x128xf32> to vector<32x128xf32>
    %162 = arith.addf %159, %161 : vector<32x128xf32>
    %c0_51 = arith.constant 0 : index
    %c0_52 = arith.constant 0 : index
    %163 = vector.load %arg8[%c0_51, %c0_52] : memref<32x128xf32, #tpu.memory_space<vmem>>, vector<32x128xf32>
    tpu.vector_store %arg8[%c0_51, %c0_52], %162 {strides = array<i32>} : memref<32x128xf32, #tpu.memory_space<vmem>>, vector<32x128xf32>,
    return
  }
  func.func @transform_0(%arg0: i32) -> (i32, i32) {
    %c0_i32 = arith.constant 0 : i32
    %c0_i32_0 = arith.constant 0 : i32
    return %arg0, %c0_i32 : i32, i32
  }
  func.func @transform_1(%arg0: i32) -> (i32, i32) {
    %c0_i32 = arith.constant 0 : i32
    %c0_i32_0 = arith.constant 0 : i32
    %c0_i32_1 = arith.constant 0 : i32
    return %c0_i32, %c0_i32_0 : i32, i32
  }
  func.func @transform_2(%arg0: i32) -> (i32, i32) {
    %c0_i32 = arith.constant 0 : i32
    %c0_i32_0 = arith.constant 0 : i32
    %c0_i32_1 = arith.constant 0 : i32
    return %c0_i32, %c0_i32_0 : i32, i32
  }
  func.func @transform_3(%arg0: i32) -> (i32, i32) {
    %c0_i32 = arith.constant 0 : i32
    %c0_i32_0 = arith.constant 0 : i32
    %c0_i32_1 = arith.constant 0 : i32
    return %c0_i32, %c0_i32_0 : i32, i32
  }
  func.func @transform_4(%arg0: i32) -> (i32, i32) {
    %c0_i32 = arith.constant 0 : i32
    %c0_i32_0 = arith.constant 0 : i32
    %c0_i32_1 = arith.constant 0 : i32
    return %c0_i32, %c0_i32_0 : i32, i32
  }
  func.func @transform_5(%arg0: i32) -> (i32, i32) {
    %c0_i32 = arith.constant 0 : i32
    %c0_i32_0 = arith.constant 0 : i32
    %c0_i32_1 = arith.constant 0 : i32
    return %c0_i32, %c0_i32_0 : i32, i32
  }
  func.func @transform_6(%arg0: i32) -> (i32, i32) {
    %c0_i32 = arith.constant 0 : i32
    %c0_i32_0 = arith.constant 0 : i32
    %c0_i32_1 = arith.constant 0 : i32
    return %c0_i32, %c0_i32_0 : i32, i32
  }
  func.func @transform_7(%arg0: i32) -> (i32, i32) {
    %c0_i32 = arith.constant 0 : i32
    %c0_i32_0 = arith.constant 0 : i32
    return %arg0, %c0_i32 : i32, i32
  }
}

</mosaic_0001>

<bundles_post_ra>
// kernel: gaussian_recurrent_forward.1
= control target key start
LH: loop header
LB: loop body
LE: loop exit
PB: predicated region body
PF: predicated region fallthrough
CT: control target
= control target key end

     0   :  { %s1639_s24 = smov 0   ;;  %s2034_s0 = inlined_call_operand.vmem [shape: bf16[64,4], index: 0, kind: input, shape index: {}]   ;;  %s2035_s1 = inlined_call_operand.vmem [shape: bf16[4,384], index: 1, kind: input, shape index: {}]   ;;  %s2036_s2 = inlined_call_operand.vmem [shape: f32[1,384], index: 2, kind: input, shape index: {}]   ;;  %s2037_s3 = inlined_call_operand.vmem [shape: bf16[128,384], index: 3, kind: input, shape index: {}]   ;;  %s2038_s4 = inlined_call_operand.vmem [shape: f32[1,128], index: 4, kind: input, shape index: {}]   ;;  %s2039_s5 = inlined_call_operand.vmem [shape: bf16[128,128], index: 5, kind: input, shape index: {}]   ;;  %s2040_s6 = inlined_call_operand.vmem [shape: f32[1,128], index: 6, kind: input, shape index: {}]   ;;  %s2041_s7 = inlined_call_operand.vmem [shape: f32[64,128], index: 7, kind: output, shape index: {}]  }
   0x1 LB: > { %s1273_s25 = sadd.s32 4294967295, %s1592_s24   ;;  %p1277_p0 = scmp.ge.s32.totalorder %s1592_s24, 1  ;;  %s1592_s24 = sphi %s1639_s24, %s17_s24  }
   0x2   : > { %p238_p1 = scmp.lt.s32.totalorder %s1592_s24, 3 }
   0x4   : > { %p239_p2 = pnand %p1277_p0, %p238_p1 }
   0x5   : > { %s1278_s26 = sshll.u32 (!%p239_p2), %s1273_s25, 2  ;;  %p1282_p4 = scmp.ne.s32.totalorder (!%p239_p2), %s1273_s25, 0 }
   0x6   : > { %242 = sbr.rel (%p239_p2) target bundleno = 1319 (0x527), region = 48  ;;  %p271_p3 = scmp.lt.s32.totalorder (!%p239_p2), %s1278_s26, 7 }
   0xd   : > { %s2043_s26 = smov (!%p271_p3, %s1278_s26), 7  ;;  %286 = sbr.rel (%p1282_p4) target bundleno = 20 (0x14), region = 52 }
   0xe   : > { %s1279_s27 = sshll.u32 %s2043_s26, 2  ;;  %s1281_s28 = sshll.u32 %s2043_s26, 3  ;;  %v1594_v0 = vmov (!%p1282_p4), 0.0  }
   0xf   : > { %s1650_s8 = scalar_lea.vmem %s2034_s0, %s1279_s27  ;;  %s1655_s11 = scalar_lea.vmem %s2041_s7, %s1281_s28  ;;  %287 = vst [vmem:[#allocation4] sm:$0xff] (!%p1282_p4), %v1594_v0 }
  0x14 PF: > { %v1660_v1 = vld [vmem:[%s2037_s3 + $0x4] ss:$12 sps:$4 sm:$0xff]   ;;  %v295_v2 = vlaneseq  ;;  %v1665_v3 = vld [vmem:[%s2037_s3] ss:$12 sps:$4 sm:$0xff]   ;;  %v1595_v4 = vmov 1983009808  }
  0x15   : > { %v323_v5 = vunpack.c.l.s4 %v1595_v4  ;;  %643 = vmatprep.subr.bf16.mxu0 %v1660_v1  ;;  %v1671_v6 = vld [vmem:[%s2037_s3 + $0x1c] ss:$12 sps:$4 sm:$0xff]   ;;  %v1676_v7 = vld [vmem:[%s2037_s3 + $0x18] ss:$12 sps:$4 sm:$0xff]   ;;  %v1596_v8 = vmov 0   ;;  %vm344_vm0 = vcmask 1041408  }
  0x16   : > { %386 = vmatprep.mubr.bf16.mxu1 %v1596_v8  ;;  %644 = vmatpush1.bf16.msra.mxu0 %v1665_v3  ;;  %v292_v9 = vld [vmem:[%s2035_s1] sm:$0x3f]  ;;  %v1683_v10 = vshrl.u32 %v295_v2, 7  ;;  %v1697_v16 = vld [vmem:[%s2037_s3 + $0x30] ss:$12 sps:$4 sm:$0xff]   ;;  %vm337_vm1 = vcmask 31744  }
  0x17   : > { %v324_v11 = vunpack.c.0.s8 %v323_v5  ;;  %675 = vmatprep.mubr.bf16.mxu0 %v1596_v8  ;;  %645 = vmatprep.subr.bf16.mxu0 %v1671_v6  ;;  %v1690_v12 = vld [vmem:[%s2037_s3 + $0x34] ss:$12 sps:$4 sm:$0xff]   ;;  %v321_v13 = vcombine.high %v292_v9, %v292_v9  ;;  %v1703_v17 = vld [vmem:[%s2037_s3 + $0x4c] ss:$12 sps:$4 sm:$0xff]   ;;  %v1718_v23 = vld [vmem:[%s2037_s3 + $0x64] ss:$12 sps:$4 sm:$0xff]  }
  0x18   : > { %v1513_v21 = vld [vmem:[%s1650_s8] sm:$0xff]   ;;  %v1712_v22 = vld [vmem:[%s2037_s3 + $0x48] ss:$12 sps:$4 sm:$0xff]   ;;  %v1597_v27 = vmov 0.0   ;;  %v1753_v31 = vld [vmem:[%s2037_s3 + $0x90] ss:$12 sps:$4 sm:$0xff]  }
  0x19   : > { %v327_v14 = vsub.s32 %v324_v11, %v1683_v10  ;;  %v1727_v25 = vld [vmem:[%s2037_s3 + $0x60] ss:$12 sps:$4 sm:$0xff]   ;;  %v1733_v26 = vld [vmem:[%s2037_s3 + $0x7c] ss:$12 sps:$4 sm:$0xff]   ;;  %v1742_v29 = vld [vmem:[%s2037_s3 + $0x78] ss:$12 sps:$4 sm:$0xff]  }
  0x1a   : > { %646 = vmatpush1.bf16.msra.mxu0 %v1676_v7  ;;  %v1520_v28 = vld [vmem:[%s1650_s8 + $0x8] sm:$0xff]   ;;  %v1748_v30 = vld [vmem:[%s2037_s3 + $0x94] ss:$12 sps:$4 sm:$0xff]   ;;  %vm1598_vm2 = vmmov 0   ;;  %v1798_v38 = vld [vmem:[%s2037_s3 + $0x38] ss:$12 sps:$4 sm:$0xff]  }
  0x1b   : > { %v328_v15 = vrot.slane %v292_v9, %v327_v14  ;;  %647 = vmatprep.subr.bf16.mxu0 %v1690_v12  ;;  %v335_v20 = vrot.slane %v321_v13, %v327_v14  ;;  %v1758_v32 = vld [vmem:[%s2037_s3 + $0xac] ss:$12 sps:$4 sm:$0xff]   ;;  %v1768_v33 = vld [vmem:[%s2037_s3 + $0xa8] ss:$12 sps:$4 sm:$0xff]   ;;  %v1770_v34 = vld [vmem:[#allocation4] sm:$0xff]  ;;  %v297_v44 = vsub.s32 0, %v1683_v10 }
  0x1c   : > { %v1776_v35 = vld [vmem:[%s2037_s3 + $0x8] ss:$12 sps:$4 sm:$0xff]   ;;  %v514_v36 = vpack.c.bf16 %v1770_v34, %v1770_v34  ;;  %v1786_v37 = vld [vmem:[%s2037_s3 + $0x20] ss:$12 sps:$4 sm:$0xff]   ;;  %v1807_v39 = vld [vmem:[%s2037_s3 + $0x50] ss:$12 sps:$4 sm:$0xff]  }
  0x1d   : > { %v336_v18 = vcombine.high %v328_v15, %v328_v15  ;;  %v346_v19 = vsel %vm344_vm0, %v328_v15, 0  ;;  %v352_v24 = vsel %vm344_vm0, %v335_v20, 0  ;;  %v1816_v40 = vld [vmem:[%s2037_s3 + $0x68] ss:$12 sps:$4 sm:$0xff]   ;;  %v1825_v41 = vld [vmem:[%s2037_s3 + $0x80] ss:$12 sps:$4 sm:$0xff]  }
  0x1e   : > { %648 = vmatpush1.bf16.msra.mxu0 %v1697_v16  ;;  %v1834_v42 = vld [vmem:[%s2037_s3 + $0x98] ss:$12 sps:$4 sm:$0xff]   ;;  %v1843_v43 = vld [vmem:[%s2037_s3 + $0xb0] ss:$12 sps:$4 sm:$0xff]   ;;  %v293_v45 = vld [vmem:[%s2036_s2] sm:$0x7] }
  0x1f   : > { %1285 = vmatprep.subr.msk.bf16.mxu1 %vm344_vm0, %v336_v18  ;;  %649 = vmatprep.subr.bf16.mxu0 %v1703_v17  ;;  %v301_v46 = vsub.s32 1, %v1683_v10  ;;  %v298_v48 = vrot.slane %v293_v45, %v297_v44  ;;  %v305_v58 = vsub.s32 2, %v1683_v10 }
  0x20   : > { %355 = vmatpush1.bf16.msra.mxu1 %v346_v19 }
  0x21   : > { %1489 = vmatprep.subr.msk.bf16.mxu1 %vm344_vm0, %v335_v20  ;;  %v302_v50 = vrot.slane %v293_v45, %v301_v46  ;;  %v306_v0 = vrot.slane %v293_v45, %v305_v58 }
  0x22   : > { %650 = vmatpush1.bf16.msra.mxu0 %v1712_v22 }
  0x23   : > { %1286 = vmatmul.mubr.msk.bf16.vlgmr.msra.gmra.mrb[0].mxu1 %vm337_vm1, %v1513_v21  ;;  %651 = vmatprep.subr.bf16.mxu0 %v1718_v23 }
  0x24   : > { %1384 = vmatpush3.bf16.msra.mxu1 %v352_v24  ;;  %396 = vmatprep.mubr.bf16.mxu1 %v1596_v8 }
  0x25   : > { %1389 = vmatprep.subr.bf16.mxu1 %v1597_v27 }
  0x26   : > { %652 = vmatpush1.bf16.msra.mxu0 %v1727_v25 }
  0x27   : > { %653 = vmatprep.subr.bf16.mxu0 %v1733_v26 }
  0x2a   : > { %654 = vmatpush1.bf16.msra.mxu0 %v1742_v29 }
  0x2b   : > { %1287 = vmatmul.mubr.msk.bf16.gmra.mrb[4].mxu1 %vm337_vm1, %v1520_v28  ;;  %655 = vmatprep.subr.bf16.mxu0 %v1748_v30 }
  0x2c   : > { %1385 = vmatprep.mubr.msk.bf16.mxu1 %vm337_vm1, %v1513_v21 }
  0x2e   : > { %656 = vmatpush1.bf16.msra.mxu0 %v1753_v31 }
  0x2f   : > { %657 = vmatprep.subr.bf16.mxu0 %v1758_v32 }
  0x32   : > { %658 = vmatpush1.bf16.msra.mxu0 %v1768_v33 }
  0x33   : > { %1386 = vmatmul.mubr.msk.bf16.vlgmr.msra.gmra.mrb[8].mxu1 %vm337_vm1, %v1520_v28  ;;  %754 = vmatprep.subr.bf16.mxu0 %v1660_v1 }
  0x34   : > { %1390 = vmatpush3.bf16.msra.mxu1 %v1776_v35  ;;  %1405 = vmatprep.mubr.msk.bf16.mxu1 %vm1598_vm2, %v1597_v27 }
  0x35   : > { %1391 = vmatprep.subr.bf16.mxu1 %v1597_v27  ;;  %676 = vmatmul.mubr.bf16.vlgmr.msra.gmra.mrb[0].mxu0 %v514_v36 }
  0x36   : > { %755 = vmatpush1.bf16.msra.mxu0 %v1665_v3  ;;  %786 = vmatprep.mubr.bf16.mxu0 %v1596_v8 }
  0x37   : > { %756 = vmatprep.subr.bf16.mxu0 %v1671_v6 }
  0x38   : > { %1392 = vmatpush3.bf16.msra.mxu1 %v1786_v37 }
  0x39   : > { %1393 = vmatprep.subr.bf16.mxu1 %v1597_v27 }
  0x3a   : > { %757 = vmatpush1.bf16.msra.mxu0 %v1676_v7 }
  0x3b   : > { %758 = vmatprep.subr.bf16.mxu0 %v1690_v12 }
  0x3c   : > { %1394 = vmatpush3.bf16.msra.mxu1 %v1798_v38 }
  0x3d   : > { %1395 = vmatprep.subr.bf16.mxu1 %v1597_v27 }
  0x3e   : > { %759 = vmatpush1.bf16.msra.mxu0 %v1697_v16 }
  0x3f   : > { %760 = vmatprep.subr.bf16.mxu0 %v1703_v17 }
  0x40   : > { %1396 = vmatpush3.bf16.msra.mxu1 %v1807_v39 }
  0x41   : > { %1397 = vmatprep.subr.bf16.mxu1 %v1597_v27 }
  0x42   : > { %761 = vmatpush1.bf16.msra.mxu0 %v1712_v22 }
  0x43   : > { %762 = vmatprep.subr.bf16.mxu0 %v1718_v23 }
  0x44   : > { %1398 = vmatpush3.bf16.msra.mxu1 %v1816_v40 }
  0x45   : > { %1399 = vmatprep.subr.bf16.mxu1 %v1597_v27 }
  0x46   : > { %763 = vmatpush1.bf16.msra.mxu0 %v1727_v25 }
  0x47   : > { %764 = vmatprep.subr.bf16.mxu0 %v1733_v26 }
  0x48   : > { %1400 = vmatpush3.bf16.msra.mxu1 %v1825_v41 }
  0x49   : > { %1401 = vmatprep.subr.bf16.mxu1 %v1597_v27 }
  0x4a   : > { %765 = vmatpush1.bf16.msra.mxu0 %v1742_v29 }
  0x4b   : > { %766 = vmatprep.subr.bf16.mxu0 %v1748_v30 }
  0x4c   : > { %1402 = vmatpush3.bf16.msra.mxu1 %v1834_v42 }
  0x4d   : > { %1403 = vmatprep.subr.bf16.mxu1 %v1597_v27 }
  0x4e   : > { %767 = vmatpush1.bf16.msra.mxu0 %v1753_v31 }
  0x4f   : > { %768 = vmatprep.subr.bf16.mxu0 %v1758_v32 }
  0x50   : > { %1404 = vmatpush3.bf16.msra.mxu1 %v1843_v43 }
  0x51   : > { %1409 = vmatprep.subr.bf16.mxu1 %v1597_v27 }
  0x52   : > { %769 = vmatpush1.bf16.msra.mxu0 %v1768_v33 }
  0x53   : > { %1406 = vmatmul.mubr.bf16.vlgmr.msra.gmra.mrb[12].mxu1 %v514_v36  ;;  %866 = vmatprep.subr.bf16.mxu0 %v1660_v1 }
  0x54   : > { %1410 = vmatpush3.bf16.msra.mxu1 %v1776_v35  ;;  %1425 = vmatprep.mubr.msk.bf16.mxu1 %vm1598_vm2, %v1597_v27 }
  0x55   : > { %1411 = vmatprep.subr.bf16.mxu1 %v1597_v27 }
  0x58   : > { %1412 = vmatpush3.bf16.msra.mxu1 %v1786_v37 }
  0x59   : > { %1413 = vmatprep.subr.bf16.mxu1 %v1597_v27 }
  0x5c   : > { %1414 = vmatpush3.bf16.msra.mxu1 %v1798_v38 }
  0x5d   : > { %1415 = vmatprep.subr.bf16.mxu1 %v1597_v27 }
  0x60   : > { %1416 = vmatpush3.bf16.msra.mxu1 %v1807_v39 }
  0x61   : > { %1417 = vmatprep.subr.bf16.mxu1 %v1597_v27 }
  0x64   : > { %1418 = vmatpush3.bf16.msra.mxu1 %v1816_v40 }
  0x65   : > { %1419 = vmatprep.subr.bf16.mxu1 %v1597_v27 }
  0x68   : > { %1420 = vmatpush3.bf16.msra.mxu1 %v1825_v41 }
  0x69   : > { %1421 = vmatprep.subr.bf16.mxu1 %v1597_v27 }
  0x6c   : > { %1422 = vmatpush3.bf16.msra.mxu1 %v1834_v42 }
  0x6d   : > { %1423 = vmatprep.subr.bf16.mxu1 %v1597_v27 }
  0x70   : > { %1424 = vmatpush3.bf16.msra.mxu1 %v1843_v43 }
  0x71   : > { %1429 = vmatprep.subr.bf16.mxu1 %v1597_v27 }
  0xf6   : > { %v388_v47 = vpop.f32.mrb[0].mxu1 }
  0xf7   : > { %v390_v49 = vpop.f32.mrb[1].mxu1  ;;  %v389_v9 = vadd.f32 %v388_v47, %v298_v48 }
  0xf8   : > { %v392_v51 = vpop.f32.mrb[2].mxu1  ;;  %v391_v13 = vadd.f32 %v390_v49, %v302_v50 }
  0xf9   : > { %v1876_v52 = vadd.f32 %v392_v51, %v298_v48  ;;  %v394_v53 = vpop.f32.mrb[3].mxu1 }
  0xfa   : > { %v1878_v54 = vadd.f32 %v394_v53, %v302_v50 }
  0xfe   : > { %v398_v55 = vpop.f32.mrb[4].mxu1 }
  0xff   : > { %v1880_v56 = vadd.f32 %v398_v55, %v298_v48  ;;  %v400_v57 = vpop.f32.mrb[5].mxu1 }
 0x100   : > { %v1883_v59 = vadd.f32 %v400_v57, %v302_v50  ;;  %v402_v60 = vpop.f32.mrb[6].mxu1 }
 0x101   : > { %v1885_v61 = vadd.f32 %v402_v60, %v298_v48  ;;  %v404_v62 = vpop.f32.mrb[7].mxu1  ;;  %v1898_v48 = vld [vmem:[%s2038_s4] ss:$0 sm:$0xff] }
 0x102   : > { %v1887_v63 = vadd.f32 %v404_v62, %v302_v50 }
 0x106   : > { %v1387_v2 = vpop.f32.mrb[8].mxu1 }
 0x107   : > { %v1889_v4 = vadd.f32 %v1387_v2, %v306_v0  ;;  %v441_v5 = vpop.f32.mrb[9].mxu1 }
 0x108   : > { %v1388_v11 = vpop.f32.mrb[10].mxu1  ;;  %v677_v10 = vpop.f32.mrb[0].mxu0  ;;  %v442_v58 = vadd.f32 %v441_v5, %v306_v0 }
 0x109   : > { %v1891_v14 = vadd.f32 %v1388_v11, %v306_v0  ;;  %v444_v15 = vpop.f32.mrb[11].mxu1  ;;  %v724_v19 = vadd.f32 %v677_v10, %v389_v9  ;;  %v679_v20 = vpop.f32.mrb[1].mxu0 }
 0x10a   : > { %v1893_v18 = vadd.f32 %v444_v15, %v306_v0  ;;  %v731_v21 = vadd.f32 %v679_v20, %v391_v13  ;;  %v681_v24 = vpop.f32.mrb[2].mxu0 }
 0x10b   : > { %v1315_v28 = vmul.f32 -1.442695, %v724_v19  ;;  %v682_v36 = vpop.f32.mrb[3].mxu0 }
 0x10c   : > { %v1316_v44 = vmul.f32 -1.442695, %v731_v21 }
 0x10d   : > { %1546 = vpow2.f32 %v1315_v28 }
 0x10e   : > { %1548 = vpow2.f32 %v1316_v44 }
 0x117   : > { %v1547_v45 = vpop.eup %1546 }
 0x118   : > { %v728_v46 = vadd.f32 1.0, %v1547_v45  ;;  %v1549_v47 = vpop.eup %1548 }
 0x119   : > { %v735_v49 = vadd.f32 1.0, %v1549_v47 }
 0x11a   : > { %1550 = vrcp.f32 %v728_v46 }
 0x11b   : > { %1552 = vrcp.f32 %v735_v49 }
 0x124   : > { %v1551_v55 = vpop.eup %1550 }
 0x125   : > { %v1553_v9 = vpop.eup %1552 }
 0x126   : > { %v718_v50 = vpop.f32.mrb[12].mxu1  ;;  %v742_v11 = vsub.f32 1.0, %v1553_v9  ;;  %v744_v10 = vmul.f32 %v1553_v9, %v1770_v34 }
 0x127   : > { %v738_v51 = vadd.f32 %v1898_v48, %v718_v50  ;;  %v1407_v53 = vpop.f32.mrb[13].mxu1 }
 0x128   : > { %v721_v57 = vpop.f32.mrb[14].mxu1 }
 0x129   : > { %v739_v60 = vmul.f32 %v1551_v55, %v738_v51  ;;  %v1408_v62 = vpop.f32.mrb[15].mxu1 }
 0x12b   : > { %v740_v2 = vadd.f32 %v739_v60, %v442_v58 }
 0x12d   : > { %1554 = vtanh.f32 %v740_v2 }
 0x137   : > { %v1555_v13 = vpop.eup %1554 }
 0x138   : > { %v743_v15 = vmul.f32 %v1555_v13, %v742_v11 }
 0x13a   : > { %v1902_v19 = vadd.f32 %v744_v10, %v743_v15  ;;  %v1539_v15 = vld [vmem:[%s2039_s5 + $0x8] sm:$0xff]   ;;  %v1540_v10 = vld [vmem:[%s2039_s5 + $0x10] sm:$0xff]  }
 0x13c   : > { %v753_v20 = vpack.c.bf16 %v1902_v19, %v1902_v19 }
 0x13e   : > { %787 = vmatmul.mubr.bf16.vlgmr.msra.gmra.mrb[4].mxu0 %v753_v20  ;;  %1426 = vmatmul.mubr.bf16.vlgmr.msra.gmra.mrb[16].mxu1 %v753_v20  ;;  %v1542_v20 = vld [vmem:[%s2039_s5 + $0x20] sm:$0xff]  }
 0x13f   : > { %867 = vmatpush1.bf16.msra.mxu0 %v1665_v3  ;;  %1430 = vmatpush3.bf16.msra.mxu1 %v1776_v35 }
 0x140   : > { %868 = vmatprep.subr.bf16.mxu0 %v1671_v6  ;;  %1431 = vmatprep.subr.bf16.mxu1 %v1597_v27 }
 0x141   : > { %898 = vmatprep.mubr.bf16.mxu0 %v1596_v8  ;;  %1445 = vmatprep.mubr.msk.bf16.mxu1 %vm1598_vm2, %v1597_v27 }
 0x143   : > { %869 = vmatpush1.bf16.msra.mxu0 %v1676_v7  ;;  %1432 = vmatpush3.bf16.msra.mxu1 %v1786_v37 }
 0x144   : > { %870 = vmatprep.subr.bf16.mxu0 %v1690_v12  ;;  %1433 = vmatprep.subr.bf16.mxu1 %v1597_v27 }
 0x147   : > { %871 = vmatpush1.bf16.msra.mxu0 %v1697_v16  ;;  %1434 = vmatpush3.bf16.msra.mxu1 %v1798_v38 }
 0x148   : > { %872 = vmatprep.subr.bf16.mxu0 %v1703_v17  ;;  %1435 = vmatprep.subr.bf16.mxu1 %v1597_v27 }
 0x14b   : > { %873 = vmatpush1.bf16.msra.mxu0 %v1712_v22  ;;  %1436 = vmatpush3.bf16.msra.mxu1 %v1807_v39 }
 0x14c   : > { %874 = vmatprep.subr.bf16.mxu0 %v1718_v23  ;;  %1437 = vmatprep.subr.bf16.mxu1 %v1597_v27 }
 0x14f   : > { %875 = vmatpush1.bf16.msra.mxu0 %v1727_v25  ;;  %1438 = vmatpush3.bf16.msra.mxu1 %v1816_v40 }
 0x150   : > { %876 = vmatprep.subr.bf16.mxu0 %v1733_v26  ;;  %1439 = vmatprep.subr.bf16.mxu1 %v1597_v27 }
 0x153   : > { %877 = vmatpush1.bf16.msra.mxu0 %v1742_v29  ;;  %1440 = vmatpush3.bf16.msra.mxu1 %v1825_v41 }
 0x154   : > { %878 = vmatprep.subr.bf16.mxu0 %v1748_v30  ;;  %1441 = vmatprep.subr.bf16.mxu1 %v1597_v27 }
 0x157   : > { %879 = vmatpush1.bf16.msra.mxu0 %v1753_v31  ;;  %1442 = vmatpush3.bf16.msra.mxu1 %v1834_v42 }
 0x158   : > { %880 = vmatprep.subr.bf16.mxu0 %v1758_v32  ;;  %1443 = vmatprep.subr.bf16.mxu1 %v1597_v27 }
 0x15b   : > { %881 = vmatpush1.bf16.msra.mxu0 %v1768_v33  ;;  %1444 = vmatpush3.bf16.msra.mxu1 %v1843_v43 }
 0x15c   : > { %978 = vmatprep.subr.bf16.mxu0 %v1660_v1  ;;  %1449 = vmatprep.subr.bf16.mxu1 %v1597_v27 }
 0x211   : > { %v788_v34 = vpop.f32.mrb[4].mxu0  ;;  %v829_v0 = vpop.f32.mrb[16].mxu1 }
 0x212   : > { %v835_v5 = vadd.f32 %v788_v34, %v1876_v52  ;;  %v790_v21 = vpop.f32.mrb[5].mxu0  ;;  %v1427_v24 = vpop.f32.mrb[17].mxu1  ;;  %v849_v55 = vadd.f32 %v1898_v48, %v829_v0  ;;  %v1543_v34 = vld [vmem:[%s2039_s5 + $0x28] sm:$0xff]   ;;  %v1544_v0 = vld [vmem:[%s2039_s5 + $0x30] sm:$0xff]  }
 0x213   : > { %v842_v28 = vadd.f32 %v790_v21, %v1878_v54  ;;  %v792_v36 = vpop.f32.mrb[6].mxu0  ;;  %v832_v44 = vpop.f32.mrb[18].mxu1 }
 0x214   : > { %v1317_v45 = vmul.f32 -1.442695, %v835_v5  ;;  %v793_v46 = vpop.f32.mrb[7].mxu0  ;;  %v1428_v47 = vpop.f32.mrb[19].mxu1  ;;  %v1545_v5 = vld [vmem:[%s2039_s5 + $0x38] sm:$0xff]  }
 0x215   : > { %v1318_v49 = vmul.f32 -1.442695, %v842_v28 }
 0x216   : > { %1556 = vpow2.f32 %v1317_v45 }
 0x217   : > { %1558 = vpow2.f32 %v1318_v49 }
 0x220   : > { %v1557_v50 = vpop.eup %1556 }
 0x221   : > { %v839_v1 = vadd.f32 1.0, %v1557_v50  ;;  %v1559_v51 = vpop.eup %1558 }
 0x222   : > { %v846_v53 = vadd.f32 1.0, %v1559_v51 }
 0x223   : > { %1560 = vrcp.f32 %v839_v1 }
 0x224   : > { %1562 = vrcp.f32 %v846_v53 }
 0x22d   : > { %v1561_v52 = vpop.eup %1560 }
 0x22e   : > { %v850_v57 = vmul.f32 %v1561_v52, %v849_v55  ;;  %v1563_v58 = vpop.eup %1562 }
 0x22f   : > { %v853_v60 = vsub.f32 1.0, %v1563_v58  ;;  %v855_v9 = vmul.f32 %v1563_v58, %v1902_v19 }
 0x230   : > { %v851_v54 = vadd.f32 %v850_v57, %v1893_v18 }
 0x232   : > { %1564 = vtanh.f32 %v851_v54 }
 0x23c   : > { %v1565_v62 = vpop.eup %1564 }
 0x23d   : > { %v854_v2 = vmul.f32 %v1565_v62, %v853_v60 }
 0x23f   : > { %v1946_v11 = vadd.f32 %v855_v9, %v854_v2 }
 0x241   : > { %v865_v13 = vpack.c.bf16 %v1946_v11, %v1946_v11  ;;  %v1088_v18 = vpack.c.bf16 %v1946_v11, %v1902_v19  ;;  %v1541_v19 = vld [vmem:[%s2039_s5 + $0x18] sm:$0xff]  }
 0x243   : > { %899 = vmatmul.mubr.bf16.vlgmr.msra.gmra.mrb[8].mxu0 %v865_v13  ;;  %1446 = vmatmul.mubr.bf16.vlgmr.msra.gmra.mrb[20].mxu1 %v865_v13 }
 0x244   : > { %979 = vmatpush1.bf16.msra.mxu0 %v1665_v3  ;;  %1450 = vmatpush3.bf16.msra.mxu1 %v1776_v35 }
 0x245   : > { %980 = vmatprep.subr.bf16.mxu0 %v1671_v6  ;;  %1451 = vmatprep.subr.bf16.mxu1 %v1597_v27 }
 0x246   : > { %1010 = vmatprep.mubr.bf16.mxu0 %v1596_v8  ;;  %1465 = vmatprep.mubr.msk.bf16.mxu1 %vm1598_vm2, %v1597_v27 }
 0x248   : > { %981 = vmatpush1.bf16.msra.mxu0 %v1676_v7  ;;  %1452 = vmatpush3.bf16.msra.mxu1 %v1786_v37 }
 0x249   : > { %982 = vmatprep.subr.bf16.mxu0 %v1690_v12  ;;  %1453 = vmatprep.subr.bf16.mxu1 %v1597_v27 }
 0x24c   : > { %983 = vmatpush1.bf16.msra.mxu0 %v1697_v16  ;;  %1454 = vmatpush3.bf16.msra.mxu1 %v1798_v38 }
 0x24d   : > { %984 = vmatprep.subr.bf16.mxu0 %v1703_v17  ;;  %1455 = vmatprep.subr.bf16.mxu1 %v1597_v27 }
 0x250   : > { %985 = vmatpush1.bf16.msra.mxu0 %v1712_v22  ;;  %1456 = vmatpush3.bf16.msra.mxu1 %v1807_v39 }
 0x251   : > { %986 = vmatprep.subr.bf16.mxu0 %v1718_v23  ;;  %1457 = vmatprep.subr.bf16.mxu1 %v1597_v27 }
 0x254   : > { %987 = vmatpush1.bf16.msra.mxu0 %v1727_v25  ;;  %1458 = vmatpush3.bf16.msra.mxu1 %v1816_v40 }
 0x255   : > { %988 = vmatprep.subr.bf16.mxu0 %v1733_v26  ;;  %1459 = vmatprep.subr.bf16.mxu1 %v1597_v27 }
 0x258   : > { %989 = vmatpush1.bf16.msra.mxu0 %v1742_v29  ;;  %1460 = vmatpush3.bf16.msra.mxu1 %v1825_v41 }
 0x259   : > { %990 = vmatprep.subr.bf16.mxu0 %v1748_v30  ;;  %1461 = vmatprep.subr.bf16.mxu1 %v1597_v27 }
 0x25c   : > { %991 = vmatpush1.bf16.msra.mxu0 %v1753_v31  ;;  %1462 = vmatpush3.bf16.msra.mxu1 %v1834_v42 }
 0x25d   : > { %992 = vmatprep.subr.bf16.mxu0 %v1758_v32  ;;  %1463 = vmatprep.subr.bf16.mxu1 %v1597_v27 }
 0x260   : > { %993 = vmatpush1.bf16.msra.mxu0 %v1768_v33  ;;  %1464 = vmatpush3.bf16.msra.mxu1 %v1843_v43 }
 0x316   : > { %v900_v3 = vpop.f32.mrb[8].mxu0  ;;  %v941_v6 = vpop.f32.mrb[20].mxu1 }
 0x317   : > { %v947_v7 = vadd.f32 %v900_v3, %v1880_v56  ;;  %v902_v8 = vpop.f32.mrb[9].mxu0  ;;  %v1447_v12 = vpop.f32.mrb[21].mxu1  ;;  %v961_v33 = vadd.f32 %v1898_v48, %v941_v6 }
 0x318   : > { %v954_v16 = vadd.f32 %v902_v8, %v1883_v59  ;;  %v904_v17 = vpop.f32.mrb[10].mxu0  ;;  %v944_v22 = vpop.f32.mrb[22].mxu1 }
 0x319   : > { %v1319_v23 = vmul.f32 -1.442695, %v947_v7  ;;  %v905_v25 = vpop.f32.mrb[11].mxu0  ;;  %v1448_v26 = vpop.f32.mrb[23].mxu1 }
 0x31a   : > { %v1320_v29 = vmul.f32 -1.442695, %v954_v16 }
 0x31b   : > { %1566 = vpow2.f32 %v1319_v23 }
 0x31c   : > { %1568 = vpow2.f32 %v1320_v29 }
 0x325   : > { %v1567_v27 = vpop.eup %1566 }
 0x326   : > { %v951_v30 = vadd.f32 1.0, %v1567_v27  ;;  %v1569_v31 = vpop.eup %1568 }
 0x327   : > { %v958_v32 = vadd.f32 1.0, %v1569_v31 }
 0x328   : > { %1570 = vrcp.f32 %v951_v30 }
 0x329   : > { %1572 = vrcp.f32 %v958_v32 }
 0x332   : > { %v1571_v35 = vpop.eup %1570 }
 0x333   : > { %v962_v37 = vmul.f32 %v1571_v35, %v961_v33  ;;  %v1573_v39 = vpop.eup %1572 }
 0x334   : > { %v965_v40 = vsub.f32 1.0, %v1573_v39  ;;  %v967_v43 = vmul.f32 %v1573_v39, %v1946_v11 }
 0x335   : > { %v963_v38 = vadd.f32 %v962_v37, %v1889_v4  ;;  %v1538_v4 = vld [vmem:[%s2039_s5] sm:$0xff]  }
 0x336   : > { %1469 = vmatprep.subr.bf16.mxu0 %v1538_v4 }
 0x337   : > { %1574 = vtanh.f32 %v963_v38 }
 0x341   : > { %v1575_v41 = vpop.eup %1574 }
 0x342   : > { %v966_v42 = vmul.f32 %v1575_v41, %v965_v40 }
 0x344   : > { %v1988_v56 = vadd.f32 %v967_v43, %v966_v42 }
 0x346   : > { %v977_v59 = vpack.c.bf16 %v1988_v56, %v1988_v56 }
 0x348   : > { %1011 = vmatmul.mubr.bf16.vlgmr.msra.gmra.mrb[12].mxu0 %v977_v59  ;;  %1466 = vmatmul.mubr.bf16.vlgmr.msra.gmra.mrb[24].mxu1 %v977_v59 }
 0x349   : > { %1485 = vmatprep.mubr.bf16.mxu0 %v1088_v18  ;;  %1470 = vmatpush3.bf16.msra.mxu0 %v1538_v4 }
 0x34a   : > { %1471 = vmatprep.subr.bf16.mxu0 %v1539_v15 }
 0x34d   : > { %1472 = vmatpush3.bf16.msra.mxu0 %v1539_v15 }
 0x34e   : > { %1473 = vmatprep.subr.bf16.mxu0 %v1540_v10 }
 0x351   : > { %1474 = vmatpush3.bf16.msra.mxu0 %v1540_v10 }
 0x352   : > { %1475 = vmatprep.subr.bf16.mxu0 %v1541_v19 }
 0x355   : > { %1476 = vmatpush3.bf16.msra.mxu0 %v1541_v19 }
 0x356   : > { %1477 = vmatprep.subr.bf16.mxu0 %v1542_v20 }
 0x359   : > { %1478 = vmatpush3.bf16.msra.mxu0 %v1542_v20 }
 0x35a   : > { %1479 = vmatprep.subr.bf16.mxu0 %v1543_v34 }
 0x35d   : > { %1480 = vmatpush3.bf16.msra.mxu0 %v1543_v34 }
 0x35e   : > { %1481 = vmatprep.subr.bf16.mxu0 %v1544_v0 }
 0x361   : > { %1482 = vmatpush3.bf16.msra.mxu0 %v1544_v0 }
 0x362   : > { %1483 = vmatprep.subr.bf16.mxu0 %v1545_v5 }
 0x365   : > { %1484 = vmatpush3.bf16.msra.mxu0 %v1545_v5 }
 0x41b   : > { %v1012_v21 = vpop.f32.mrb[12].mxu0  ;;  %v1053_v24 = vpop.f32.mrb[24].mxu1 }
 0x41c   : > { %v1059_v28 = vadd.f32 %v1012_v21, %v1885_v61  ;;  %v1014_v36 = vpop.f32.mrb[13].mxu0  ;;  %v1467_v44 = vpop.f32.mrb[25].mxu1  ;;  %v1073_v54 = vadd.f32 %v1898_v48, %v1053_v24 }
 0x41d   : > { %v1066_v45 = vadd.f32 %v1014_v36, %v1887_v63  ;;  %v1016_v46 = vpop.f32.mrb[14].mxu0  ;;  %v1056_v47 = vpop.f32.mrb[26].mxu1 }
 0x41e   : > { %v1321_v49 = vmul.f32 -1.442695, %v1059_v28  ;;  %v1017_v50 = vpop.f32.mrb[15].mxu0  ;;  %v1468_v1 = vpop.f32.mrb[27].mxu1 }
 0x41f   : > { %v1322_v51 = vmul.f32 -1.442695, %v1066_v45 }
 0x420   : > { %1576 = vpow2.f32 %v1321_v49 }
 0x421   : > { %1578 = vpow2.f32 %v1322_v51 }
 0x42a   : > { %v1577_v53 = vpop.eup %1576 }
 0x42b   : > { %v1063_v55 = vadd.f32 1.0, %v1577_v53  ;;  %v1579_v52 = vpop.eup %1578 }
 0x42c   : > { %v1070_v57 = vadd.f32 1.0, %v1579_v52 }
 0x42d   : > { %1580 = vrcp.f32 %v1063_v55 }
 0x42e   : > { %1582 = vrcp.f32 %v1070_v57 }
 0x437   : > { %v1581_v61 = vpop.eup %1580 }
 0x438   : > { %v1074_v58 = vmul.f32 %v1581_v61, %v1073_v54  ;;  %v1583_v60 = vpop.eup %1582 }
 0x439   : > { %v1077_v62 = vsub.f32 1.0, %v1583_v60  ;;  %v1079_v11 = vmul.f32 %v1583_v60, %v1988_v56 }
 0x43a   : > { %v1075_v63 = vadd.f32 %v1074_v58, %v1891_v14  ;;  %v1323_v14 = vld [vmem:[%s2040_s6] ss:$0 sm:$0xff] }
 0x43c   : > { %1584 = vtanh.f32 %v1075_v63 }
 0x446   : > { %v1585_v2 = vpop.eup %1584 }
 0x447   : > { %v1078_v9 = vmul.f32 %v1585_v2, %v1077_v62 }
 0x449   : > { %v1080_v13 = vadd.f32 %v1079_v11, %v1078_v9 }
 0x44b   : > { %1083 = vst [vmem:[#allocation4] sm:$0xff] %v1080_v13  ;;  %v1089_v48 = vpack.c.bf16 %v1080_v13, %v1988_v56 }
 0x44d   : > { %1486 = vmatmul.mubr.bf16.vlgmr.msra.gmra.mrb[16].mxu0 %v1089_v48 }
 0x520   : > { %v1487_v3 = vpop.f32.mrb[16].mxu0 }
 0x521   : > { %v1195_v6 = vpop.f32.mrb[17].mxu0  ;;  %v1204_v17 = vadd.f32 %v1487_v3, %v1323_v14 }
 0x522   : > { %v1196_v7 = vadd.f32 %v1323_v14, %v1195_v6  ;;  %v1488_v8 = vpop.f32.mrb[18].mxu0 }
 0x523   : > { %v1198_v12 = vpop.f32.mrb[19].mxu0  ;;  %v1207_v22 = vadd.f32 %v1488_v8, %v1323_v14  ;;  %1212 = vst [vmem:[%s1655_s11 + $0x10] sm:$0xff] %v1204_v17 }
 0x524   : > { %1210 = vst [vmem:[%s1655_s11] sm:$0xff] %v1196_v7  ;;  %v1199_v16 = vadd.f32 %v1323_v14, %v1198_v12 }
 0x525   : > { %1213 = vst [vmem:[%s1655_s11 + $0x18] sm:$0xff] %v1207_v22 }
 0x526   : > { %1211 = vst [vmem:[%s1655_s11 + $0x8] sm:$0xff] %v1199_v16 }
 0x527 PF: > { %s17_s24 = sadd.s32 1, %s1592_s24  }
 0x528   : > { %p14_p5 = scmp.ge.s32.totalorder %s17_s24, 4  }
 0x52a   :  { %16 = sbr.rel (!%p14_p5) target bundleno = 1 (0x1), region = 89 }

</bundles_post_ra>
